<compile_context>
chip_gen: v7x
topology: tpu7x:2x2x1
jax: 0.10.0
libtpu: 0.0.40
codegen_flags: <defaults>
</compile_context>

<pallas_src>
import functools
import math

import jax
import jax.numpy as jnp
from jax.experimental import pallas as pl
from jax.experimental.pallas import tpu as pltpu


_SMALL_BATCH = 2048   # at/below this batch size, use the no-grid path
_TILE_B = 2048        # nominal batch tile for the gridded path (multiple of 8)


def actor_kernel(x_ref, w1_ref, b1_ref, w2_ref, b2_ref, w3_ref, b3_ref, o_ref):
    """fc1->relu->fc2->relu->fc3->tanh.  bf16 matmul inputs, f32 elsewhere."""
    # x arrives as f32; cast to bf16 in-kernel (rides free VPU slots).
    xb = x_ref[...].astype(jnp.bfloat16)
    # fc1 + relu  (bf16 x bf16 -> f32 accumulation on the MXU)
    h1 = jnp.dot(xb, w1_ref[...], preferred_element_type=jnp.float32)
    h1 = jnp.maximum(h1 + b1_ref[...], 0.0)
    # fc2 + relu
    h2 = jnp.dot(h1.astype(jnp.bfloat16), w2_ref[...],
                 preferred_element_type=jnp.float32)
    h2 = jnp.maximum(h2 + b2_ref[...], 0.0)
    # fc3 + tanh  (unpadded output: only action_dim lanes are stored)
    h3 = jnp.dot(h2.astype(jnp.bfloat16), w3_ref[...],
                 preferred_element_type=jnp.float32)
    o_ref[...] = jnp.tanh(h3 + b3_ref[...])


def prepare_actor_params(params):
    """One-time preprocessing: bf16 matmul weights, f32 biases.  Call once."""
    w1, b1, w2, b2, w3, b3 = params
    return (w1.astype(jnp.bfloat16), b1.astype(jnp.float32),
            w2.astype(jnp.bfloat16), b2.astype(jnp.float32),
            w3.astype(jnp.bfloat16), b3.astype(jnp.float32))


def _round_up(x, m):
    return ((x + m - 1) // m) * m


@functools.partial(jax.jit, static_argnames=("tile_b",))
def actor_forward(x, prepared_params, *, tile_b=_TILE_B):
    """x: (B, state_dim) f32.  prepared_params from prepare_actor_params."""
    w1b, b1, w2b, b2, w3b, b3 = prepared_params
    B, state_dim = x.shape
    action_dim = w3b.shape[1]

    vmem = pl.BlockSpec(memory_space=pltpu.MemorySpace.VMEM)

    if B <= _SMALL_BATCH:
        # Single shot: no grid, no pipelining bookkeeping -- all operands
        # (~100 KB weights + x + out) live as whole-array VMEM blocks.
        return pl.pallas_call(
            actor_kernel,
            in_specs=[vmem] * 7,
            out_specs=vmem,
            out_shape=jax.ShapeDtypeStruct((B, action_dim), jnp.float32),
        )(x, w1b, b1, w2b, b2, w3b, b3)

    # ---- gridded path: resident weights, megacore-parallel batch axis ----
    # Choose an EVEN number of grid steps (>= 2) so v7x's two TensorCores get
    # balanced work; each tile is a multiple of 8 sublanes.
    nb = max(2, pl.cdiv(B, tile_b))
    if nb % 2:
        nb += 1
    tb = _round_up(pl.cdiv(B, nb), 8)
    b_padded = nb * tb
    if b_padded != B:
        # Pad the f32 input once; padded rows produce finite garbage, sliced off.
        x = jnp.pad(x, ((0, b_padded - B), (0, 0)))

    def const_spec(shape):
        return pl.BlockSpec(shape, lambda i: (0, 0))

    out = pl.pallas_call(
        actor_kernel,
        grid=(nb,),
        in_specs=[
            pl.BlockSpec((tb, state_dim), lambda i: (i, 0)),
            const_spec(w1b.shape), const_spec(b1.shape),
            const_spec(w2b.shape), const_spec(b2.shape),
            const_spec(w3b.shape), const_spec(b3.shape),
        ],
        out_specs=pl.BlockSpec((tb, action_dim), lambda i: (i, 0)),
        out_shape=jax.ShapeDtypeStruct((b_padded, action_dim), jnp.float32),
        compiler_params=pltpu.CompilerParams(
            dimension_semantics=("parallel",)),
    )(x, w1b, b1, w2b, b2, w3b, b3)
    return out[:B] if b_padded != B else out


# ----------------------------- init (matches the PyTorch Actor) --------------

def xavier_uniform(key, fan_in, fan_out):
    limit = math.sqrt(6.0 / (fan_in + fan_out))
    # stored as (in, out) -- transposed relative to PyTorch's (out, in)
    return jax.random.uniform(key, (fan_in, fan_out), jnp.float32, -limit, limit)


def linear_default(key, fan_in, fan_out):
    # mimics PyTorch nn.Linear default (kaiming-uniform a=sqrt(5)) bound
    bound = 1.0 / math.sqrt(fan_in)
    return jax.random.uniform(key, (fan_in, fan_out), jnp.float32, -bound, bound)


def bias_default(key, fan_in, fan_out):
    bound = 1.0 / math.sqrt(fan_in)
    return jax.random.uniform(key, (1, fan_out), jnp.float32, -bound, bound)


def init_actor_params(key, state_dim, action_dim):
    k = jax.random.split(key, 6)
    w1 = xavier_uniform(k[0], state_dim, 256)       # fc1.weight (xavier, per spec)
    b1 = bias_default(k[1], state_dim, 256)
    w2 = linear_default(k[2], 256, 128)             # fc2.weight (default init)
    b2 = bias_default(k[3], 256, 128)
    w3 = xavier_uniform(k[4], 128, action_dim)      # fc3.weight (xavier, per spec)
    b3 = bias_default(k[5], 128, action_dim)
    return (w1, b1, w2, b2, w3, b3)


# ----------------------------- references ------------------------------------

def actor_reference_f32(x, params):
    w1, b1, w2, b2, w3, b3 = params
    h1 = jnp.maximum(x @ w1 + b1, 0.0)
    h2 = jnp.maximum(h1 @ w2 + b2, 0.0)
    return jnp.tanh(h2 @ w3 + b3)


def actor_reference_bf16(x, params):
    # same math as the kernel: bf16 matmul inputs, f32 accumulation/activations
    w1, b1, w2, b2, w3, b3 = params
    bf = jnp.bfloat16
    h1 = jnp.maximum(jnp.dot(x.astype(bf), w1.astype(bf),
                             preferred_element_type=jnp.float32) + b1, 0.0)
    h2 = jnp.maximum(jnp.dot(h1.astype(bf), w2.astype(bf),
                             preferred_element_type=jnp.float32) + b2, 0.0)
    h3 = jnp.dot(h2.astype(bf), w3.astype(bf),
                 preferred_element_type=jnp.float32) + b3
    return jnp.tanh(h3)


if __name__ == "__main__":
    key = jax.random.PRNGKey(0)
    k_param, k_x, k_xl = jax.random.split(key, 3)

    batch, state_dim, action_dim = 8, 16, 4
    params = init_actor_params(k_param, state_dim, action_dim)
    prepared = jax.tree.map(jax.block_until_ready, prepare_actor_params(params))

    # Small batch -> single-shot (no grid) path.
    x = jax.random.normal(k_x, (batch, state_dim), jnp.float32)
    out = jax.block_until_ready(actor_forward(x, prepared))
    assert out.shape == (batch, action_dim)
    assert jnp.allclose(out, actor_reference_bf16(x, params),
                        atol=1e-3, rtol=1e-3), "mismatch vs bf16 reference"
    assert jnp.allclose(out, actor_reference_f32(x, params),
                        atol=5e-2, rtol=5e-2), "mismatch vs f32 reference"

    # Larger batch -> batch-tiled path (resident weights, even parallel grid,
    # non-multiple batch to exercise padding + slice).
    big_batch = 4100
    xl = jax.random.normal(k_xl, (big_batch, state_dim), jnp.float32)
    outl = jax.block_until_ready(actor_forward(xl, prepared))
    assert outl.shape == (big_batch, action_dim)
    assert jnp.allclose(outl, actor_reference_bf16(xl, params),
                        atol=1e-3, rtol=1e-3), "tiled-path mismatch"

    print("KERNEL_OK")
</pallas_src>

<mosaic_0001>
module attributes {stable_mosaic.version = 11 : i64} {
  func.func @actor_kernel(%arg0: memref<8x16xf32, #tpu.memory_space<vmem>>, %arg1: memref<16x256xbf16, #tpu.memory_space<vmem>>, %arg2: memref<1x256xf32, #tpu.memory_space<vmem>>, %arg3: memref<256x128xbf16, #tpu.memory_space<vmem>>, %arg4: memref<1x128xf32, #tpu.memory_space<vmem>>, %arg5: memref<128x4xbf16, #tpu.memory_space<vmem>>, %arg6: memref<1x4xf32, #tpu.memory_space<vmem>>, %arg7: memref<8x4xf32, #tpu.memory_space<vmem>>) attributes {dimension_semantics = [], scalar_prefetch = 0 : i64, scratch_operands = 0 : i64, tpu.core_type = #tpu.core_type<tc>} {
    %c0 = arith.constant 0 : index
    %c0_0 = arith.constant 0 : index
    %0 = vector.load %arg0[%c0, %c0_0] : memref<8x16xf32, #tpu.memory_space<vmem>>, vector<8x16xf32>
    %1 = arith.truncf %0 : vector<8x16xf32> to vector<8x16xbf16>
    %c0_1 = arith.constant 0 : index
    %c0_2 = arith.constant 0 : index
    %2 = vector.load %arg1[%c0_1, %c0_2] : memref<16x256xbf16, #tpu.memory_space<vmem>>, vector<16x256xbf16>
    %cst = arith.constant dense<0.000000e+00> : vector<8x256xf32>
    %3 = tpu.matmul %1, %2, %cst {dimension_numbers = #tpu.dot_dimension_numbers<[1], [0], [0], [1], [0, 0, 1, 1], [], []>} : vector<8x16xbf16>, vector<16x256xbf16>, vector<8x256xf32> -> vector<8x256xf32>
    %c0_3 = arith.constant 0 : index
    %c0_4 = arith.constant 0 : index
    %4 = vector.load %arg2[%c0_3, %c0_4] : memref<1x256xf32, #tpu.memory_space<vmem>>, vector<1x256xf32>
    %5 = vector.broadcast %4 : vector<1x256xf32> to vector<8x256xf32>
    %6 = arith.addf %3, %5 : vector<8x256xf32>
    %cst_5 = arith.constant 0.000000e+00 : f32
    %7 = vector.broadcast %cst_5 : f32 to vector<8x256xf32>
    %8 = arith.maximumf %6, %7 : vector<8x256xf32>
    %9 = arith.truncf %8 : vector<8x256xf32> to vector<8x256xbf16>
    %c0_6 = arith.constant 0 : index
    %c0_7 = arith.constant 0 : index
    %10 = vector.load %arg3[%c0_6, %c0_7] : memref<256x128xbf16, #tpu.memory_space<vmem>>, vector<256x128xbf16>
    %cst_8 = arith.constant dense<0.000000e+00> : vector<8x128xf32>
    %11 = tpu.matmul %9, %10, %cst_8 {dimension_numbers = #tpu.dot_dimension_numbers<[1], [0], [0], [1], [0, 0, 1, 1], [], []>} : vector<8x256xbf16>, vector<256x128xbf16>, vector<8x128xf32> -> vector<8x128xf32>
    %c0_9 = arith.constant 0 : index
    %c0_10 = arith.constant 0 : index
    %12 = vector.load %arg4[%c0_9, %c0_10] : memref<1x128xf32, #tpu.memory_space<vmem>>, vector<1x128xf32>
    %13 = vector.broadcast %12 : vector<1x128xf32> to vector<8x128xf32>
    %14 = arith.addf %11, %13 : vector<8x128xf32>
    %cst_11 = arith.constant 0.000000e+00 : f32
    %15 = vector.broadcast %cst_11 : f32 to vector<8x128xf32>
    %16 = arith.maximumf %14, %15 : vector<8x128xf32>
    %17 = arith.truncf %16 : vector<8x128xf32> to vector<8x128xbf16>
    %c0_12 = arith.constant 0 : index
    %c0_13 = arith.constant 0 : index
    %18 = vector.load %arg5[%c0_12, %c0_13] : memref<128x4xbf16, #tpu.memory_space<vmem>>, vector<128x4xbf16>
    %cst_14 = arith.constant dense<0.000000e+00> : vector<8x4xf32>
    %19 = tpu.matmul %17, %18, %cst_14 {dimension_numbers = #tpu.dot_dimension_numbers<[1], [0], [0], [1], [0, 0, 1, 1], [], []>} : vector<8x128xbf16>, vector<128x4xbf16>, vector<8x4xf32> -> vector<8x4xf32>
    %c0_15 = arith.constant 0 : index
    %c0_16 = arith.constant 0 : index
    %20 = vector.load %arg6[%c0_15, %c0_16] : memref<1x4xf32, #tpu.memory_space<vmem>>, vector<1x4xf32>
    %21 = vector.broadcast %20 : vector<1x4xf32> to vector<8x4xf32>
    %22 = arith.addf %19, %21 : vector<8x4xf32>
    %23 = math.tanh %22 : vector<8x4xf32>
    %c0_17 = arith.constant 0 : index
    %c0_18 = arith.constant 0 : index
    %24 = vector.load %arg7[%c0_17, %c0_18] : memref<8x4xf32, #tpu.memory_space<vmem>>, vector<8x4xf32>
    tpu.vector_store %arg7[%c0_17, %c0_18], %23 {strides = array<i32>} : memref<8x4xf32, #tpu.memory_space<vmem>>, vector<8x4xf32>,
    return
  }
}

</mosaic_0001>

<bundles_post_ra>
// kernel: actor_forward.1
= control target key start
LH: loop header
LB: loop body
LE: loop exit
PB: predicated region body
PF: predicated region fallthrough
CT: control target
= control target key end

     0   :  { %12 = vsyncpa [#allocation3], 0  ;;  %s551_s24 = smov [#allocation2]   ;;  %s654_s0 = inlined_call_operand.vmem [shape: f32[8,16], index: 0, kind: input, shape index: {}]   ;;  %s655_s1 = inlined_call_operand.vmem [shape: bf16[16,256], index: 1, kind: input, shape index: {}]   ;;  %s656_s2 = inlined_call_operand.vmem [shape: f32[1,256], index: 2, kind: input, shape index: {}]   ;;  %s657_s3 = inlined_call_operand.hbm [shape: bf16[256,128], index: 3, kind: input, shape index: {}]   ;;  %s658_s4 = inlined_call_operand.vmem [shape: f32[1,128], index: 4, kind: input, shape index: {}]   ;;  %s659_s5 = inlined_call_operand.vmem [shape: bf16[128,4], index: 5, kind: input, shape index: {}]   ;;  %s660_s6 = inlined_call_operand.vmem [shape: f32[1,4], index: 6, kind: input, shape index: {}]   ;;  %s661_s7 = inlined_call_operand.vmem [shape: f32[8,4], index: 7, kind: output, shape index: {}]  }
   0x1   :  { %s24_s25 = sshll.u32 %s551_s24, 4  ;;  %s527_s28 = scalar_lea.hbm %s657_s3, 2048  ;;  %s25_s25 = int_to_ptr.vmem [resolvable:$true] %s24_s25 }
   0x2   :  { %p528_p0 = scmp.ne.s32.totalorder %s657_s3, %s527_s28  ;;  %p531_p1 = scmp.lt.u32.totalorder %s527_s28, %s657_s3 }
   0x4   :  { %p533_p2 = pnand %p531_p1, %p528_p0 }
   0x6   :  { %536 = shalt.err (!%p533_p2)
}
   0x7   :  { %s537_s10 = scalar_lea.vmem %s25_s25, 2048  ;;  %p542_p4 = scmp.lt.s32.totalorder %s25_s25, %s25_s25 }
   0x8   :  { %p538_p3 = scmp.ne.s32.totalorder %s25_s25, %s537_s10  ;;  %p543_p5 = scmp.lt.s32.totalorder %s537_s10, %s537_s10 }
   0xa   :  { %p544_p6 = por %p543_p5, %p542_p4 }
   0xc   :  { %p545_p7 = pnand %p544_p6, %p538_p3 }
   0xe   :  { %548 = shalt.err (!%p545_p7)
}
   0xf   :  { %s552_s11 = smov 64   ;;  %s553_s12 = smov 4  }
  0x10   :  { %30 = dma.hbm_to_vmem [thread:$0]  %s657_s3, 2048, %s25_s25, [#allocation3], %s552_s11, %s552_s11, %s553_s12  }
  0x11   :  { %549 = dma.done.wait [#allocation3], 2048  }
  0x12   :  { %550 = vsyncadd [#allocation3], 4294965248  ;;  %v554_v0 = vmov 0   ;;  %v498_v1 = vld [vmem:[%s655_s1 + $0x4] ss:$8 sps:$4 sm:$0xff]   ;;  %vm67_vm0 = vcmask 130048   ;;  %v47_v28 = vlaneseq }
  0x13   :  { %103 = vmatprep.mubr.bf16.mxu0 %v554_v0  ;;  %v500_v2 = vld [vmem:[%s655_s1] ss:$8 sps:$4 sm:$0xff]   ;;  %71 = vmatprep.subr.bf16.mxu0 %v498_v1  ;;  %v505_v9 = vld [vmem:[#allocation2 + $0x50] sm:$0xff]   ;;  %v507_v11 = vld [vmem:[#allocation2 + $0x58] sm:$0xff]   ;;  %v555_v22 = vmov 0.0   ;;  %vm556_vm1 = vmmov 0  }
  0x14   :  { %v41_v3 = vld [vmem:[%s654_s0] sm:$0xff]  ;;  %72 = vmatpush1.bf16.msra.mxu0 %v500_v2  ;;  %v503_v7 = vld [vmem:[#allocation2 + $0x48] sm:$0xff]   ;;  %v506_v10 = vld [vmem:[#allocation2 + $0x10] sm:$0xff]   ;;  %v48_v29 = vshrl.u32 %v47_v28, 7  ;;  %vm405_vm2 = vcmask 31744  }
  0x15   :  { %v42_v4 = vpack.c.bf16 %v41_v3, %v41_v3  ;;  %v501_v5 = vld [vmem:[#allocation2 + $0x40] sm:$0xff]   ;;  %v504_v8 = vld [vmem:[#allocation2 + $0x8] sm:$0xff]   ;;  %v508_v12 = vld [vmem:[#allocation2 + $0x18] sm:$0xff]   ;;  %472 = vmatprep.subr.bf16.mxu0 %v555_v22 }
  0x16   :  { %v502_v6 = vld [vmem:[#allocation2] sm:$0xff]   ;;  %441 = vmatprep.subr.bf16.mxu1 %v501_v5  ;;  %v511_v15 = vld [vmem:[#allocation2 + $0x68] sm:$0xff]   ;;  %v513_v17 = vld [vmem:[#allocation2 + $0x70] sm:$0xff]   ;;  %v49_v30 = vsub.s32 0, %v48_v29  ;;  %v53_v32 = vsub.s32 1, %v48_v29 }
  0x17   :  { %442 = vmatpush3.bf16.msra.mxu1 %v502_v6  ;;  %414 = vmatmul.mubr.msk.bf16.vlgmr.msra.gmra.mrb[0].mxu0 %vm67_vm0, %v42_v4  ;;  %v509_v13 = vld [vmem:[#allocation2 + $0x60] sm:$0xff]   ;;  %v512_v16 = vld [vmem:[#allocation2 + $0x28] sm:$0xff]   ;;  %v514_v18 = vld [vmem:[#allocation2 + $0x30] sm:$0xff]  }
  0x18   :  { %443 = vmatprep.subr.bf16.mxu1 %v503_v7  ;;  %v510_v14 = vld [vmem:[#allocation2 + $0x20] sm:$0xff]   ;;  %v515_v19 = vld [vmem:[#allocation2 + $0x78] sm:$0xff]   ;;  %v518_v23 = vld [vmem:[%s659_s5 + $0x8] sm:$0xff]   ;;  %488 = vmatprep.mubr.msk.bf16.mxu0 %vm556_vm1, %v555_v22 }
  0x19   :  { %v516_v20 = vld [vmem:[#allocation2 + $0x38] sm:$0xff]   ;;  %v517_v21 = vld [vmem:[%s659_s5] sm:$0xff]   ;;  %v519_v24 = vld [vmem:[%s659_s5 + $0x10] sm:$0xff]  }
  0x1a   :  { %473 = vmatpush3.bf16.msra.mxu0 %v517_v21  ;;  %v520_v25 = vld [vmem:[%s659_s5 + $0x18] sm:$0xff]   ;;  %v521_v26 = vld [vmem:[%s659_s5 + $0x20] sm:$0xff]   ;;  %v522_v27 = vld [vmem:[%s659_s5 + $0x28] sm:$0xff]  }
  0x1b   :  { %444 = vmatpush3.bf16.msra.mxu1 %v504_v8  ;;  %474 = vmatprep.subr.bf16.mxu0 %v555_v22  ;;  %v45_v31 = vld [vmem:[%s656_s2] sm:$0x3]  ;;  %v523_v45 = vld [vmem:[%s659_s5 + $0x30] sm:$0xff]   ;;  %v524_v46 = vld [vmem:[%s659_s5 + $0x38] sm:$0xff]  }
  0x1c   :  { %445 = vmatprep.subr.bf16.mxu1 %v505_v9  ;;  %v50_v33 = vrot.slane %v45_v31, %v49_v30  ;;  %v54_v34 = vrot.slane %v45_v31, %v53_v32  ;;  %v415_v48 = vld [vmem:[%s658_s4] ss:$0 sm:$0xff] }
  0x1d   :  { %v432_v56 = vld [vmem:[%s660_s6] ss:$0 sm:$0xff] }
  0x1e   :  { %475 = vmatpush3.bf16.msra.mxu0 %v518_v23 }
  0x1f   :  { %446 = vmatpush3.bf16.msra.mxu1 %v506_v10  ;;  %476 = vmatprep.subr.bf16.mxu0 %v555_v22 }
  0x20   :  { %447 = vmatprep.subr.bf16.mxu1 %v507_v11 }
  0x22   :  { %477 = vmatpush3.bf16.msra.mxu0 %v519_v24 }
  0x23   :  { %448 = vmatpush3.bf16.msra.mxu1 %v508_v12  ;;  %478 = vmatprep.subr.bf16.mxu0 %v555_v22 }
  0x24   :  { %449 = vmatprep.subr.bf16.mxu1 %v509_v13 }
  0x26   :  { %479 = vmatpush3.bf16.msra.mxu0 %v520_v25 }
  0x27   :  { %450 = vmatpush3.bf16.msra.mxu1 %v510_v14  ;;  %480 = vmatprep.subr.bf16.mxu0 %v555_v22 }
  0x28   :  { %451 = vmatprep.subr.bf16.mxu1 %v511_v15 }
  0x2a   :  { %481 = vmatpush3.bf16.msra.mxu0 %v521_v26 }
  0x2b   :  { %452 = vmatpush3.bf16.msra.mxu1 %v512_v16  ;;  %482 = vmatprep.subr.bf16.mxu0 %v555_v22 }
  0x2c   :  { %453 = vmatprep.subr.bf16.mxu1 %v513_v17 }
  0x2e   :  { %483 = vmatpush3.bf16.msra.mxu0 %v522_v27 }
  0x2f   :  { %454 = vmatpush3.bf16.msra.mxu1 %v514_v18  ;;  %484 = vmatprep.subr.bf16.mxu0 %v555_v22 }
  0x30   :  { %455 = vmatprep.subr.bf16.mxu1 %v515_v19 }
  0x32   :  { %485 = vmatpush3.bf16.msra.mxu0 %v523_v45 }
  0x33   :  { %456 = vmatpush3.bf16.msra.mxu1 %v516_v20  ;;  %486 = vmatprep.subr.bf16.mxu0 %v555_v22 }
  0x36   :  { %487 = vmatpush3.bf16.msra.mxu0 %v524_v46 }
  0xea   :  { %v105_v35 = vpop.f32.mrb[0].mxu0 }
  0xeb   :  { %v106_v36 = vadd.f32 %v105_v35, %v50_v33  ;;  %v107_v37 = vpop.f32.mrb[1].mxu0 }
  0xec   :  { %v108_v38 = vadd.f32 %v107_v37, %v54_v34  ;;  %v109_v39 = vpop.f32.mrb[2].mxu0 }
  0xed   :  { %v112_v40 = vmax.f32 %v106_v36, 0.0  ;;  %v110_v41 = vpop.f32.mrb[3].mxu0 }
  0xee   :  { %v113_v42 = vmax.f32 %v108_v38, 0.0 }
  0xef   :  { %v114_v44 = vpack.c.bf16 %v112_v40, %v112_v40 }
  0xf0   :  { %v115_v43 = vpack.c.bf16 %v113_v42, %v113_v42 }
  0xf2   :  { %283 = vmatprep.mubr.bf16.mxu1 %v115_v43 }
  0xf3   :  { %284 = vmatmul.mubr.bf16.vlgmr.msra.gmra.mrb[0].mxu1 %v114_v44 }
 0x1c6   :  { %v457_v47 = vpop.f32.mrb[0].mxu1 }
 0x1c7   :  { %v458_v49 = vpop.f32.mrb[1].mxu1 }
 0x1c8   :  { %v459_v50 = vadd.f32 %v458_v49, %v457_v47  ;;  %v460_v51 = vpop.f32.mrb[2].mxu1 }
 0x1c9   :  { %v461_v52 = vpop.f32.mrb[3].mxu1 }
 0x1ca   :  { %v286_v53 = vadd.f32 %v459_v50, %v415_v48 }
 0x1cc   :  { %v291_v54 = vmax.f32 %v286_v53, 0.0 }
 0x1ce   :  { %v292_v55 = vpack.c.bf16 %v291_v54, %v291_v54 }
 0x1d0   :  { %489 = vmatmul.mubr.bf16.vlgmr.msra.gmra.mrb[4].mxu0 %v292_v55 }
 0x2a3   :  { %v398_v57 = vpop.f32.mrb[4].mxu0 }
 0x2a4   :  { %v399_v58 = vadd.f32 %v432_v56, %v398_v57  ;;  %v490_v59 = vpop.f32.mrb[5].mxu0 }
 0x2a5   :  { %v401_v60 = vpop.f32.mrb[6].mxu0 }
 0x2a6   :  { %525 = vtanh.f32 %v399_v58  ;;  %v491_v61 = vpop.f32.mrb[7].mxu0 }
 0x2b0   :  { %v526_v62 = vpop.eup %525 }
 0x2b1   :  { %406 = vst.msk [vmem:[%s661_s7] sm:$0xff] %vm405_vm2, %v526_v62 }
 0x2b2   :  { %411 = vsyncpa [#allocation3], 1 }

</bundles_post_ra>
